<compile_context>
chip_gen: v5e
topology: v5e:2x2
jax: 0.10.0
libtpu: 0.0.40
codegen_flags: <defaults>
</compile_context>

<pallas_src>
import functools

import jax
import jax.numpy as jnp
from jax.experimental import pallas as pl
from jax.experimental.pallas import tpu as pltpu

LANE = 128      # lane width: last dim of every block padded to a multiple of this
SUBLANE = 8     # f32/bf16-safe sublane granularity for the batch axis
MAX_TB = 512    # cap on batch-tile rows (keeps double-buffered tiles small in VMEM)


def _round_up(x, m):
    return ((x + m - 1) // m) * m


# ---------------------------------------------------------------------------
# Fused kernel: one batch tile through all layers.
# refs = (x_ref, w0, b0, w1, b1, ..., w{L-1}, b{L-1}, o_ref)
# ---------------------------------------------------------------------------
def _make_fused_mlp_kernel(n_layers, compute_dtype):
    def kernel(*refs):
        x_ref = refs[0]
        o_ref = refs[-1]
        wb_refs = refs[1:-1]

        h = x_ref[...]                              # (TB, d_pad) bf16 (compute dtype)
        for l in range(n_layers):                   # static unroll over layers
            w = wb_refs[2 * l][...]                 # (din_pad, dout_pad) bf16, VMEM-resident
            b = wb_refs[2 * l + 1][...]             # (1, dout_pad) f32,  VMEM-resident
            y = jnp.dot(h.astype(compute_dtype), w,
                        preferred_element_type=jnp.float32)   # MXU, f32 accumulate
            h = jnp.maximum(y + b, 0.0)             # bias + ReLU in f32 (VPU)
        o_ref[...] = h.astype(o_ref.dtype)

    return kernel


# ---------------------------------------------------------------------------
# Parameter construction / padding
# ---------------------------------------------------------------------------
def init_mlp_params(key, in_dim, mid_dim, out_dim, num_layers=3, dtype=jnp.float32):
    """Init mirroring torch.nn.Linear (uniform +/- 1/sqrt(fan_in)).

    Weights are stored as (in_features, out_features), i.e. the transpose of
    torch.nn.Linear.weight, so the kernel computes x @ W directly.
    """
    dims = [(in_dim, mid_dim)] + [(mid_dim, mid_dim)] * num_layers + [(mid_dim, out_dim)]
    params = []
    for (din, dout) in dims:
        key, kw, kb = jax.random.split(key, 3)
        bound = 1.0 / jnp.sqrt(din)
        w = jax.random.uniform(kw, (din, dout), dtype, minval=-bound, maxval=bound)
        b = jax.random.uniform(kb, (dout,), dtype, minval=-bound, maxval=bound)
        params.append((w, b))
    return params


def pad_params(params, compute_dtype=jnp.bfloat16):
    """Zero-pad every layer's feature dims up to a multiple of 128 lanes.

    Weights are cast to the MXU compute dtype (bf16); biases stay f32 for the
    f32 epilogue.
    """
    padded = []
    for (w, b) in params:
        din, dout = w.shape
        din_p = _round_up(din, LANE)
        dout_p = _round_up(dout, LANE)
        w_p = jnp.zeros((din_p, dout_p), compute_dtype)
        w_p = w_p.at[:din, :dout].set(w.astype(compute_dtype))
        b_p = jnp.zeros((1, dout_p), jnp.float32)
        b_p = b_p.at[0, :dout].set(b.astype(jnp.float32))
        padded.append((w_p, b_p))
    return tuple(padded)


# ---------------------------------------------------------------------------
# Fused forward pass
# ---------------------------------------------------------------------------
@functools.partial(jax.jit, static_argnames=("out_dim",))
def mlp_forward(x, padded_params, *, out_dim):
    batch, in_dim = x.shape
    n_layers = len(padded_params)
    din_pad = padded_params[0][0].shape[0]
    dout_pad = padded_params[-1][0].shape[1]
    compute_dtype = padded_params[0][0].dtype

    # Balanced batch tiling: cap tile rows at MAX_TB but split evenly so batch
    # padding waste is at most one sublane group per tile (never ~2x like a
    # fixed 512 tile would give for e.g. batch=600).
    batch_r = _round_up(batch, SUBLANE)
    n_tiles = -(-batch_r // MAX_TB)
    tb = _round_up(-(-batch_r // n_tiles), SUBLANE)
    b_pad = n_tiles * tb
    grid = (n_tiles,)

    # Lane-dense, batch-padded input in the MXU compute dtype (bf16): halves
    # the input HBM traffic; padded rows/lanes are zeros -> exact through ReLU.
    x_p = jnp.zeros((b_pad, din_pad), compute_dtype)
    x_p = x_p.at[:batch, :in_dim].set(x.astype(compute_dtype))

    in_specs = [pl.BlockSpec((tb, din_pad), lambda i: (i, 0))]
    flat_args = [x_p]
    for (w_p, b_p) in padded_params:
        # Constant index_map -> weights/biases stay resident in VMEM across steps.
        in_specs.append(pl.BlockSpec(w_p.shape, lambda i: (0, 0)))
        in_specs.append(pl.BlockSpec(b_p.shape, lambda i: (0, 0)))
        flat_args.append(w_p)
        flat_args.append(b_p)

    out_pad = pl.pallas_call(
        _make_fused_mlp_kernel(n_layers, compute_dtype),
        out_shape=jax.ShapeDtypeStruct((b_pad, dout_pad), jnp.float32),
        grid=grid,
        in_specs=in_specs,
        out_specs=pl.BlockSpec((tb, dout_pad), lambda i: (i, 0)),
        compiler_params=pltpu.CompilerParams(
            dimension_semantics=("parallel",),  # batch tiles independent -> megacore/2-TC
        ),
    )(*flat_args)

    return out_pad[:batch, :out_dim]


# ---------------------------------------------------------------------------
# Pure-JAX references
# ---------------------------------------------------------------------------
def mlp_forward_ref(x, params, compute_dtype=jnp.float32):
    h = x
    for (w, b) in params:
        y = jnp.dot(h.astype(compute_dtype), w.astype(compute_dtype),
                    preferred_element_type=jnp.float32)
        h = jnp.maximum(y + b.astype(jnp.float32), 0.0)
    return h


if __name__ == "__main__":
    key = jax.random.PRNGKey(0)
    in_dim, mid_dim, out_dim, num_layers = 16, 32, 8, 3
    batch = 8

    kx, kp = jax.random.split(key)
    x = jax.random.normal(kx, (batch, in_dim), dtype=jnp.float32)
    params = init_mlp_params(kp, in_dim, mid_dim, out_dim, num_layers)
    padded = pad_params(params, compute_dtype=jnp.bfloat16)

    out = mlp_forward(x, padded, out_dim=out_dim)
    out = jax.block_until_ready(out)
    assert out.shape == (batch, out_dim), out.shape

    # Exact-math check vs. a reference doing the same bf16-input / f32-accumulate matmuls.
    ref_bf16 = mlp_forward_ref(x, params, compute_dtype=jnp.bfloat16)
    assert jnp.allclose(out, ref_bf16, atol=2e-3, rtol=2e-3), "mismatch vs bf16 reference"

    # Loose sanity check vs. the full-f32 reference (bf16 MXU inputs).
    ref_f32 = mlp_forward_ref(x, params, compute_dtype=jnp.float32)
    assert jnp.allclose(out, ref_f32, atol=1e-1, rtol=1e-1), "mismatch vs f32 reference"

    print("KERNEL_OK")
</pallas_src>

<mosaic_0001>
module attributes {stable_mosaic.version = 11 : i64} {
  func.func @kernel(%arg0: i32, %arg1: memref<8x128xbf16, #tpu.memory_space<vmem>>, %arg2: memref<128x128xbf16, #tpu.memory_space<vmem>>, %arg3: memref<1x128xf32, #tpu.memory_space<vmem>>, %arg4: memref<128x128xbf16, #tpu.memory_space<vmem>>, %arg5: memref<1x128xf32, #tpu.memory_space<vmem>>, %arg6: memref<128x128xbf16, #tpu.memory_space<vmem>>, %arg7: memref<1x128xf32, #tpu.memory_space<vmem>>, %arg8: memref<128x128xbf16, #tpu.memory_space<vmem>>, %arg9: memref<1x128xf32, #tpu.memory_space<vmem>>, %arg10: memref<128x128xbf16, #tpu.memory_space<vmem>>, %arg11: memref<1x128xf32, #tpu.memory_space<vmem>>, %arg12: memref<8x128xf32, #tpu.memory_space<vmem>>) attributes {dimension_semantics = [#tpu.dimension_semantics<parallel>], iteration_bounds = array<i64: 1>, scalar_prefetch = 0 : i64, scratch_operands = 0 : i64, tpu.core_type = #tpu.core_type<tc>, window_params = [{transform_indices = @transform_0, window_bounds = array<i64: 8, 128>}, {pipeline_mode = #tpu.pipeline_mode<synchronous>, transform_indices = @transform_1, window_bounds = array<i64: 128, 128>}, {pipeline_mode = #tpu.pipeline_mode<synchronous>, transform_indices = @transform_2, window_bounds = array<i64: 1, 128>}, {pipeline_mode = #tpu.pipeline_mode<synchronous>, transform_indices = @transform_3, window_bounds = array<i64: 128, 128>}, {pipeline_mode = #tpu.pipeline_mode<synchronous>, transform_indices = @transform_4, window_bounds = array<i64: 1, 128>}, {pipeline_mode = #tpu.pipeline_mode<synchronous>, transform_indices = @transform_5, window_bounds = array<i64: 128, 128>}, {pipeline_mode = #tpu.pipeline_mode<synchronous>, transform_indices = @transform_6, window_bounds = array<i64: 1, 128>}, {pipeline_mode = #tpu.pipeline_mode<synchronous>, transform_indices = @transform_7, window_bounds = array<i64: 128, 128>}, {pipeline_mode = #tpu.pipeline_mode<synchronous>, transform_indices = @transform_8, window_bounds = array<i64: 1, 128>}, {pipeline_mode = #tpu.pipeline_mode<synchronous>, transform_indices = @transform_9, window_bounds = array<i64: 128, 128>}, {pipeline_mode = #tpu.pipeline_mode<synchronous>, transform_indices = @transform_10, window_bounds = array<i64: 1, 128>}, {transform_indices = @transform_11, window_bounds = array<i64: 8, 128>}]} {
    %c0 = arith.constant 0 : index
    %c0_0 = arith.constant 0 : index
    %0 = vector.load %arg1[%c0, %c0_0] : memref<8x128xbf16, #tpu.memory_space<vmem>>, vector<8x128xbf16>
    %c0_1 = arith.constant 0 : index
    %c0_2 = arith.constant 0 : index
    %1 = vector.load %arg2[%c0_1, %c0_2] : memref<128x128xbf16, #tpu.memory_space<vmem>>, vector<128x128xbf16>
    %c0_3 = arith.constant 0 : index
    %c0_4 = arith.constant 0 : index
    %2 = vector.load %arg3[%c0_3, %c0_4] : memref<1x128xf32, #tpu.memory_space<vmem>>, vector<1x128xf32>
    %cst = arith.constant dense<0.000000e+00> : vector<8x128xf32>
    %3 = tpu.matmul %0, %1, %cst {dimension_numbers = #tpu.dot_dimension_numbers<[1], [0], [0], [1], [0, 0, 1, 1], [], []>} : vector<8x128xbf16>, vector<128x128xbf16>, vector<8x128xf32> -> vector<8x128xf32>
    %4 = vector.broadcast %2 : vector<1x128xf32> to vector<8x128xf32>
    %5 = arith.addf %3, %4 : vector<8x128xf32>
    %cst_5 = arith.constant 0.000000e+00 : f32
    %6 = vector.broadcast %cst_5 : f32 to vector<8x128xf32>
    %7 = arith.maximumf %5, %6 : vector<8x128xf32>
    %c0_6 = arith.constant 0 : index
    %c0_7 = arith.constant 0 : index
    %8 = vector.load %arg4[%c0_6, %c0_7] : memref<128x128xbf16, #tpu.memory_space<vmem>>, vector<128x128xbf16>
    %c0_8 = arith.constant 0 : index
    %c0_9 = arith.constant 0 : index
    %9 = vector.load %arg5[%c0_8, %c0_9] : memref<1x128xf32, #tpu.memory_space<vmem>>, vector<1x128xf32>
    %10 = arith.truncf %7 : vector<8x128xf32> to vector<8x128xbf16>
    %cst_10 = arith.constant dense<0.000000e+00> : vector<8x128xf32>
    %11 = tpu.matmul %10, %8, %cst_10 {dimension_numbers = #tpu.dot_dimension_numbers<[1], [0], [0], [1], [0, 0, 1, 1], [], []>} : vector<8x128xbf16>, vector<128x128xbf16>, vector<8x128xf32> -> vector<8x128xf32>
    %12 = vector.broadcast %9 : vector<1x128xf32> to vector<8x128xf32>
    %13 = arith.addf %11, %12 : vector<8x128xf32>
    %cst_11 = arith.constant 0.000000e+00 : f32
    %14 = vector.broadcast %cst_11 : f32 to vector<8x128xf32>
    %15 = arith.maximumf %13, %14 : vector<8x128xf32>
    %c0_12 = arith.constant 0 : index
    %c0_13 = arith.constant 0 : index
    %16 = vector.load %arg6[%c0_12, %c0_13] : memref<128x128xbf16, #tpu.memory_space<vmem>>, vector<128x128xbf16>
    %c0_14 = arith.constant 0 : index
    %c0_15 = arith.constant 0 : index
    %17 = vector.load %arg7[%c0_14, %c0_15] : memref<1x128xf32, #tpu.memory_space<vmem>>, vector<1x128xf32>
    %18 = arith.truncf %15 : vector<8x128xf32> to vector<8x128xbf16>
    %cst_16 = arith.constant dense<0.000000e+00> : vector<8x128xf32>
    %19 = tpu.matmul %18, %16, %cst_16 {dimension_numbers = #tpu.dot_dimension_numbers<[1], [0], [0], [1], [0, 0, 1, 1], [], []>} : vector<8x128xbf16>, vector<128x128xbf16>, vector<8x128xf32> -> vector<8x128xf32>
    %20 = vector.broadcast %17 : vector<1x128xf32> to vector<8x128xf32>
    %21 = arith.addf %19, %20 : vector<8x128xf32>
    %cst_17 = arith.constant 0.000000e+00 : f32
    %22 = vector.broadcast %cst_17 : f32 to vector<8x128xf32>
    %23 = arith.maximumf %21, %22 : vector<8x128xf32>
    %c0_18 = arith.constant 0 : index
    %c0_19 = arith.constant 0 : index
    %24 = vector.load %arg8[%c0_18, %c0_19] : memref<128x128xbf16, #tpu.memory_space<vmem>>, vector<128x128xbf16>
    %c0_20 = arith.constant 0 : index
    %c0_21 = arith.constant 0 : index
    %25 = vector.load %arg9[%c0_20, %c0_21] : memref<1x128xf32, #tpu.memory_space<vmem>>, vector<1x128xf32>
    %26 = arith.truncf %23 : vector<8x128xf32> to vector<8x128xbf16>
    %cst_22 = arith.constant dense<0.000000e+00> : vector<8x128xf32>
    %27 = tpu.matmul %26, %24, %cst_22 {dimension_numbers = #tpu.dot_dimension_numbers<[1], [0], [0], [1], [0, 0, 1, 1], [], []>} : vector<8x128xbf16>, vector<128x128xbf16>, vector<8x128xf32> -> vector<8x128xf32>
    %28 = vector.broadcast %25 : vector<1x128xf32> to vector<8x128xf32>
    %29 = arith.addf %27, %28 : vector<8x128xf32>
    %cst_23 = arith.constant 0.000000e+00 : f32
    %30 = vector.broadcast %cst_23 : f32 to vector<8x128xf32>
    %31 = arith.maximumf %29, %30 : vector<8x128xf32>
    %c0_24 = arith.constant 0 : index
    %c0_25 = arith.constant 0 : index
    %32 = vector.load %arg10[%c0_24, %c0_25] : memref<128x128xbf16, #tpu.memory_space<vmem>>, vector<128x128xbf16>
    %c0_26 = arith.constant 0 : index
    %c0_27 = arith.constant 0 : index
    %33 = vector.load %arg11[%c0_26, %c0_27] : memref<1x128xf32, #tpu.memory_space<vmem>>, vector<1x128xf32>
    %34 = arith.truncf %31 : vector<8x128xf32> to vector<8x128xbf16>
    %cst_28 = arith.constant dense<0.000000e+00> : vector<8x128xf32>
    %35 = tpu.matmul %34, %32, %cst_28 {dimension_numbers = #tpu.dot_dimension_numbers<[1], [0], [0], [1], [0, 0, 1, 1], [], []>} : vector<8x128xbf16>, vector<128x128xbf16>, vector<8x128xf32> -> vector<8x128xf32>
    %36 = vector.broadcast %33 : vector<1x128xf32> to vector<8x128xf32>
    %37 = arith.addf %35, %36 : vector<8x128xf32>
    %cst_29 = arith.constant 0.000000e+00 : f32
    %38 = vector.broadcast %cst_29 : f32 to vector<8x128xf32>
    %39 = arith.maximumf %37, %38 : vector<8x128xf32>
    %c0_30 = arith.constant 0 : index
    %c0_31 = arith.constant 0 : index
    %40 = vector.load %arg12[%c0_30, %c0_31] : memref<8x128xf32, #tpu.memory_space<vmem>>, vector<8x128xf32>
    tpu.vector_store %arg12[%c0_30, %c0_31], %39 {strides = array<i32>} : memref<8x128xf32, #tpu.memory_space<vmem>>, vector<8x128xf32>,
    return
  }
  func.func @transform_0(%arg0: i32) -> (i32, i32) {
    %c0_i32 = arith.constant 0 : i32
    %c0_i32_0 = arith.constant 0 : i32
    return %arg0, %c0_i32 : i32, i32
  }
  func.func @transform_1(%arg0: i32) -> (i32, i32) {
    %c0_i32 = arith.constant 0 : i32
    %c0_i32_0 = arith.constant 0 : i32
    %c0_i32_1 = arith.constant 0 : i32
    return %c0_i32, %c0_i32_0 : i32, i32
  }
  func.func @transform_2(%arg0: i32) -> (i32, i32) {
    %c0_i32 = arith.constant 0 : i32
    %c0_i32_0 = arith.constant 0 : i32
    %c0_i32_1 = arith.constant 0 : i32
    return %c0_i32, %c0_i32_0 : i32, i32
  }
  func.func @transform_3(%arg0: i32) -> (i32, i32) {
    %c0_i32 = arith.constant 0 : i32
    %c0_i32_0 = arith.constant 0 : i32
    %c0_i32_1 = arith.constant 0 : i32
    return %c0_i32, %c0_i32_0 : i32, i32
  }
  func.func @transform_4(%arg0: i32) -> (i32, i32) {
    %c0_i32 = arith.constant 0 : i32
    %c0_i32_0 = arith.constant 0 : i32
    %c0_i32_1 = arith.constant 0 : i32
    return %c0_i32, %c0_i32_0 : i32, i32
  }
  func.func @transform_5(%arg0: i32) -> (i32, i32) {
    %c0_i32 = arith.constant 0 : i32
    %c0_i32_0 = arith.constant 0 : i32
    %c0_i32_1 = arith.constant 0 : i32
    return %c0_i32, %c0_i32_0 : i32, i32
  }
  func.func @transform_6(%arg0: i32) -> (i32, i32) {
    %c0_i32 = arith.constant 0 : i32
    %c0_i32_0 = arith.constant 0 : i32
    %c0_i32_1 = arith.constant 0 : i32
    return %c0_i32, %c0_i32_0 : i32, i32
  }
  func.func @transform_7(%arg0: i32) -> (i32, i32) {
    %c0_i32 = arith.constant 0 : i32
    %c0_i32_0 = arith.constant 0 : i32
    %c0_i32_1 = arith.constant 0 : i32
    return %c0_i32, %c0_i32_0 : i32, i32
  }
  func.func @transform_8(%arg0: i32) -> (i32, i32) {
    %c0_i32 = arith.constant 0 : i32
    %c0_i32_0 = arith.constant 0 : i32
    %c0_i32_1 = arith.constant 0 : i32
    return %c0_i32, %c0_i32_0 : i32, i32
  }
  func.func @transform_9(%arg0: i32) -> (i32, i32) {
    %c0_i32 = arith.constant 0 : i32
    %c0_i32_0 = arith.constant 0 : i32
    %c0_i32_1 = arith.constant 0 : i32
    return %c0_i32, %c0_i32_0 : i32, i32
  }
  func.func @transform_10(%arg0: i32) -> (i32, i32) {
    %c0_i32 = arith.constant 0 : i32
    %c0_i32_0 = arith.constant 0 : i32
    %c0_i32_1 = arith.constant 0 : i32
    return %c0_i32, %c0_i32_0 : i32, i32
  }
  func.func @transform_11(%arg0: i32) -> (i32, i32) {
    %c0_i32 = arith.constant 0 : i32
    %c0_i32_0 = arith.constant 0 : i32
    return %arg0, %c0_i32 : i32, i32
  }
}

</mosaic_0001>

<bundles_post_ra>
// kernel: mlp_forward.1
= control target key start
LH: loop header
LB: loop body
LE: loop exit
PB: predicated region body
PF: predicated region fallthrough
CT: control target
= control target key end

     0   :  { %16 = vsyncpa [#allocation3], 0  ;;  %s1021_s0 = inlined_call_operand.vmem [shape: bf16[8,128], index: 0, kind: input, shape index: {}]   ;;  %s1022_s1 = inlined_call_operand.hbm [shape: bf16[128,128], index: 1, kind: input, shape index: {}]   ;;  %s1023_s2 = inlined_call_operand.vmem [shape: f32[1,128], index: 2, kind: input, shape index: {}]   ;;  %s1024_s3 = inlined_call_operand.hbm [shape: bf16[128,128], index: 3, kind: input, shape index: {}]   ;;  %s1025_s4 = inlined_call_operand.vmem [shape: f32[1,128], index: 4, kind: input, shape index: {}]   ;;  %s1026_s5 = inlined_call_operand.hbm [shape: bf16[128,128], index: 5, kind: input, shape index: {}]   ;;  %s1027_s6 = inlined_call_operand.vmem [shape: f32[1,128], index: 6, kind: input, shape index: {}]   ;;  %s1028_s7 = inlined_call_operand.hbm [shape: bf16[128,128], index: 7, kind: input, shape index: {}]   ;;  %s1029_s8 = inlined_call_operand.vmem [shape: f32[1,128], index: 8, kind: input, shape index: {}]   ;;  %s1030_s9 = inlined_call_operand.hbm [shape: bf16[128,128], index: 9, kind: input, shape index: {}]   ;;  %s1031_s10 = inlined_call_operand.vmem [shape: f32[1,128], index: 10, kind: input, shape index: {}]   ;;  %s1032_s11 = inlined_call_operand.hbm [shape: f32[8,128], index: 11, kind: output, shape index: {}]  }
   0x1   :  { %17 = vsyncpa [#allocation6], 0 }
   0x2   :  { %18 = vsyncpa [#allocation9], 0 }
   0x3   :  { %19 = vsyncpa [#allocation4], 0  ;;  %s41_s19 = sshll.u32 %s1024_s3, 4  ;;  %s917_s20 = smov [#allocation5]   ;;  %s42_s19 = int_to_ptr.hbm [resolvable:$true] %s41_s19 }
   0x4   :  { %s43_s21 = sshll.u32 %s917_s20, 4  ;;  %s71_s24 = sshll.u32 %s1028_s7, 4  ;;  %s44_s21 = int_to_ptr.vmem [resolvable:$true] %s43_s21  ;;  %s72_s24 = int_to_ptr.hbm [resolvable:$true] %s71_s24 }
   0x5   :  { %s918_s25 = smov 64   ;;  %s919_s26 = smov 4  }
   0x6   :  { %49 = dma.hbm_to_vmem [thread:$0]  %s42_s19, 1024, %s44_s21, [#allocation6], %s918_s25, %s918_s25, %s919_s26  }
   0x7   :  { %s920_s27 = smov [#allocation8]   ;;  %s26_s12 = sshll.u32 %s1022_s1, 4  ;;  %s27_s12 = int_to_ptr.hbm [resolvable:$true] %s26_s12 }
   0x8   :  { %s73_s28 = sshll.u32 %s920_s27, 4  ;;  %s56_s14 = sshll.u32 %s1026_s5, 4  ;;  %s74_s28 = int_to_ptr.vmem [resolvable:$true] %s73_s28  ;;  %s57_s14 = int_to_ptr.hbm [resolvable:$true] %s56_s14 }
   0x9   :  { %79 = dma.hbm_to_vmem [thread:$0]  %s72_s24, 1024, %s74_s28, [#allocation9], %s918_s25, %s918_s25, %s919_s26  }
   0xa   :  { %s921_s15 = smov [#allocation2]   ;;  %s922_s7 = smov [#allocation7]  }
   0xb   :  { %s28_s16 = sshll.u32 %s921_s15, 4  ;;  %s58_s17 = sshll.u32 %s922_s7, 4  ;;  %s29_s16 = int_to_ptr.vmem [resolvable:$true] %s28_s16  ;;  %s59_s17 = int_to_ptr.vmem [resolvable:$true] %s58_s17 }
   0xc   :  { %34 = dma.hbm_to_vmem [thread:$0]  %s27_s12, 1024, %s29_s16, [#allocation3], %s918_s25, %s918_s25, %s919_s26  }
   0xd   :  { %s86_s20 = sshll.u32 %s1030_s9, 4  ;;  %s923_s1 = smov [#allocation10]   ;;  %s87_s20 = int_to_ptr.hbm [resolvable:$true] %s86_s20 }
   0xe   :  { %64 = dma.hbm_to_vmem [thread:$0]  %s57_s14, 1024, %s59_s17, [#allocation6], %s918_s25, %s918_s25, %s919_s26  }
   0xf   :  { %s88_s21 = sshll.u32 %s923_s1, 4  ;;  %s89_s21 = int_to_ptr.vmem [resolvable:$true] %s88_s21 }
  0x10   :  { %94 = dma.hbm_to_vmem [thread:$0]  %s87_s20, 1024, %s89_s21, [#allocation9], %s918_s25, %s918_s25, %s919_s26  }
  0x11   :  { %909 = dma.done.wait [#allocation3], 1024  }
  0x12   :  { %910 = vsyncadd [#allocation3], 4294966272 }
  0x13   :  { %911 = dma.done.wait [#allocation6], 2048  }
  0x14   :  { %912 = vsyncadd [#allocation6], 4294965248 }
  0x15   :  { %913 = dma.done.wait [#allocation9], 2048  }
  0x16   :  { %914 = vsyncadd [#allocation9], 4294965248  ;;  %v719_v0 = vld [vmem:[#allocation2 + $0x38] sm:$0xff]  ;;  %v718_v1 = vld [vmem:[#allocation2 + $0x30] sm:$0xff]  ;;  %s924_s28 = smov [#allocation11]   ;;  %s540_s3 = sshll.u32 %s1032_s11, 4  ;;  %s541_s3 = int_to_ptr.hbm [resolvable:$true] %s540_s3 }
  0x17   :  { %186 = vmatpush.bf16.msra.mxu0 %v719_v0  ;;  %v727_v2 = vld [vmem:[#allocation5 + $0x38] sm:$0xff]  ;;  %v717_v3 = vld [vmem:[#allocation2 + $0x28] sm:$0xff]  ;;  %v726_v4 = vld [vmem:[#allocation5 + $0x30] sm:$0xff]  ;;  %s538_s29 = sshll.u32 %s924_s28, 4  ;;  %s539_s29 = int_to_ptr.vmem [resolvable:$true] %s538_s29 }
  0x18   :  { %269 = vmatpush.bf16.msra.mxu1 %v727_v2  ;;  %v725_v5 = vld [vmem:[#allocation5 + $0x28] sm:$0xff]  ;;  %v716_v6 = vld [vmem:[#allocation2 + $0x20] sm:$0xff]  ;;  %v715_v8 = vld [vmem:[#allocation2 + $0x18] sm:$0xff] }
  0x19   :  { %v724_v7 = vld [vmem:[#allocation5 + $0x20] sm:$0xff]  ;;  %v723_v9 = vld [vmem:[#allocation5 + $0x18] sm:$0xff]  ;;  %v714_v10 = vld [vmem:[#allocation2 + $0x10] sm:$0xff] }
  0x1a   :  { %v722_v11 = vld [vmem:[#allocation5 + $0x10] sm:$0xff]  ;;  %v713_v12 = vld [vmem:[#allocation2 + $0x8] sm:$0xff]  ;;  %v712_v13 = vld [vmem:[#allocation2] sm:$0xff] }
  0x1b   :  { %187 = vmatpush.bf16.msra.mxu0 %v718_v1  ;;  %v117_v14 = vld [vmem:[%s1021_s0] sm:$0xf]  ;;  %v721_v15 = vld [vmem:[#allocation5 + $0x8] sm:$0xff]  ;;  %v735_v17 = vld [vmem:[#allocation7 + $0x38] sm:$0xff] }
  0x1c   :  { %270 = vmatpush.bf16.msra.mxu1 %v726_v4  ;;  %v720_v16 = vld [vmem:[#allocation5] sm:$0xff]  ;;  %352 = vmatpush.bf16.msra.mxu2 %v735_v17  ;;  %v734_v18 = vld [vmem:[#allocation7 + $0x30] sm:$0xff]  ;;  %v733_v19 = vld [vmem:[#allocation7 + $0x28] sm:$0xff] }
  0x1d   :  { %v732_v20 = vld [vmem:[#allocation7 + $0x20] sm:$0xff]  ;;  %v731_v21 = vld [vmem:[#allocation7 + $0x18] sm:$0xff]  ;;  %v730_v22 = vld [vmem:[#allocation7 + $0x10] sm:$0xff] }
  0x1e   :  { %v760_v23 = vld [vmem:[%s1023_s2] ss:$0 sm:$0xff]  ;;  %v729_v29 = vld [vmem:[#allocation7 + $0x8] sm:$0xff]  ;;  %v743_v31 = vld [vmem:[#allocation8 + $0x38] sm:$0xff] }
  0x1f   :  { %188 = vmatpush.bf16.msra.mxu0 %v717_v3  ;;  %v728_v30 = vld [vmem:[#allocation7] sm:$0xff]  ;;  %435 = vmatpush.bf16.msra.mxu3 %v743_v31  ;;  %v742_v32 = vld [vmem:[#allocation8 + $0x30] sm:$0xff]  ;;  %v741_v33 = vld [vmem:[#allocation8 + $0x28] sm:$0xff] }
  0x20   :  { %271 = vmatpush.bf16.msra.mxu1 %v725_v5  ;;  %353 = vmatpush.bf16.msra.mxu2 %v734_v18  ;;  %v740_v34 = vld [vmem:[#allocation8 + $0x20] sm:$0xff]  ;;  %v739_v35 = vld [vmem:[#allocation8 + $0x18] sm:$0xff]  ;;  %v738_v36 = vld [vmem:[#allocation8 + $0x10] sm:$0xff] }
  0x21   :  { %v761_v37 = vld [vmem:[%s1025_s4] ss:$0 sm:$0xff]  ;;  %v737_v43 = vld [vmem:[#allocation8 + $0x8] sm:$0xff]  ;;  %v751_v45 = vld [vmem:[#allocation10 + $0x38] sm:$0xff] }
  0x22   :  { %v736_v44 = vld [vmem:[#allocation8] sm:$0xff]  ;;  %v750_v46 = vld [vmem:[#allocation10 + $0x30] sm:$0xff]  ;;  %v749_v47 = vld [vmem:[#allocation10 + $0x28] sm:$0xff] }
  0x23   :  { %189 = vmatpush.bf16.msra.mxu0 %v716_v6  ;;  %436 = vmatpush.bf16.msra.mxu3 %v742_v32  ;;  %v748_v48 = vld [vmem:[#allocation10 + $0x20] sm:$0xff]  ;;  %v747_v49 = vld [vmem:[#allocation10 + $0x18] sm:$0xff]  ;;  %v746_v50 = vld [vmem:[#allocation10 + $0x10] sm:$0xff] }
  0x24   :  { %272 = vmatpush.bf16.msra.mxu1 %v724_v7  ;;  %354 = vmatpush.bf16.msra.mxu2 %v733_v19  ;;  %v762_v51 = vld [vmem:[%s1027_s6] ss:$0 sm:$0xff]  ;;  %v745_v57 = vld [vmem:[#allocation10 + $0x8] sm:$0xff] }
  0x25   :  { %v744_v58 = vld [vmem:[#allocation10] sm:$0xff] }
  0x26   :  { %v763_v59 = vld [vmem:[%s1029_s8] ss:$0 sm:$0xff] }
  0x27   :  { %190 = vmatpush.bf16.msra.mxu0 %v715_v8  ;;  %437 = vmatpush.bf16.msra.mxu3 %v741_v33  ;;  %v764_v1 = vld [vmem:[%s1031_s10] ss:$0 sm:$0xff] }
  0x28   :  { %273 = vmatpush.bf16.msra.mxu1 %v723_v9  ;;  %355 = vmatpush.bf16.msra.mxu2 %v732_v20 }
  0x2b   :  { %191 = vmatpush.bf16.msra.mxu0 %v714_v10  ;;  %438 = vmatpush.bf16.msra.mxu3 %v740_v34 }
  0x2c   :  { %274 = vmatpush.bf16.msra.mxu1 %v722_v11  ;;  %356 = vmatpush.bf16.msra.mxu2 %v731_v21 }
  0x2f   :  { %192 = vmatpush.bf16.msra.mxu0 %v713_v12  ;;  %439 = vmatpush.bf16.msra.mxu3 %v739_v35 }
  0x30   :  { %275 = vmatpush.bf16.msra.mxu1 %v721_v15  ;;  %357 = vmatpush.bf16.msra.mxu2 %v730_v22 }
  0x33   :  { %193 = vmatpush.bf16.msra.mxu0 %v712_v13  ;;  %440 = vmatpush.bf16.msra.mxu3 %v738_v36 }
  0x34   :  { %276 = vmatpush.bf16.msra.mxu1 %v720_v16  ;;  %358 = vmatpush.bf16.msra.mxu2 %v729_v29 }
  0x36   :  { %194 = vmatmul.bf16.vlgmr.msra.gmra.mxu0 %v117_v14 }
  0x37   :  { %441 = vmatpush.bf16.msra.mxu3 %v737_v43  ;;  %518 = vmatpush.bf16.msrb.mxu0 %v751_v45 }
  0x38   :  { %359 = vmatpush.bf16.msra.mxu2 %v728_v30 }
  0x3b   :  { %442 = vmatpush.bf16.msra.mxu3 %v736_v44  ;;  %519 = vmatpush.bf16.msrb.mxu0 %v750_v46 }
  0x3f   :  { %520 = vmatpush.bf16.msrb.mxu0 %v749_v47 }
  0x43   :  { %521 = vmatpush.bf16.msrb.mxu0 %v748_v48 }
  0x47   :  { %522 = vmatpush.bf16.msrb.mxu0 %v747_v49 }
  0x4b   :  { %523 = vmatpush.bf16.msrb.mxu0 %v746_v50 }
  0x4f   :  { %524 = vmatpush.bf16.msrb.mxu0 %v745_v57 }
  0x53   :  { %525 = vmatpush.bf16.msrb.mxu0 %v744_v58 }
  0xb3   :  { %v195_v24 = vpop.f32.mrf.mxu0 }
  0xb4   :  { %v196_v25 = vadd.f32 %v760_v23, %v195_v24 }
  0xb6   :  { %v199_v26 = vmax.f32 %v196_v25, 0.0 }
  0xb8   :  { %v217_v27 = vpack.c.bf16 %v199_v26, %v199_v26 }
  0xba   :  { %277 = vmatmul.bf16.vlgmr.msra.gmra.mxu1 %v217_v27 }
  0xbb   :  { %v197_v28 = vpop.f32.mrf.mxu0 }
 0x137   :  { %v278_v38 = vpop.f32.mrf.mxu1 }
 0x138   :  { %v279_v39 = vadd.f32 %v761_v37, %v278_v38 }
 0x13a   :  { %v282_v40 = vmax.f32 %v279_v39, 0.0 }
 0x13c   :  { %v300_v41 = vpack.c.bf16 %v282_v40, %v282_v40 }
 0x13e   :  { %360 = vmatmul.bf16.vlgmr.msra.gmra.mxu2 %v300_v41 }
 0x13f   :  { %v280_v42 = vpop.f32.mrf.mxu1 }
 0x1c1   :  { %v361_v52 = vpop.f32.mrf.mxu2 }
 0x1c2   :  { %v362_v53 = vadd.f32 %v762_v51, %v361_v52 }
 0x1c4   :  { %v365_v54 = vmax.f32 %v362_v53, 0.0 }
 0x1c6   :  { %v383_v55 = vpack.c.bf16 %v365_v54, %v365_v54 }
 0x1c8   :  { %443 = vmatmul.bf16.vlgmr.msra.gmra.mxu3 %v383_v55 }
 0x1c9   :  { %v363_v56 = vpop.f32.mrf.mxu2 }
 0x24b   :  { %v444_v60 = vpop.f32.mrf.mxu3 }
 0x24c   :  { %v445_v61 = vadd.f32 %v763_v59, %v444_v60 }
 0x24e   :  { %v448_v62 = vmax.f32 %v445_v61, 0.0 }
 0x250   :  { %v466_v63 = vpack.c.bf16 %v448_v62, %v448_v62 }
 0x252   :  { %526 = vmatmul.bf16.vlgmr.msrb.gmra.mxu0 %v466_v63 }
 0x253   :  { %v446_v0 = vpop.f32.mrf.mxu3 }
 0x2cf   :  { %v527_v2 = vpop.f32.mrf.mxu0 }
 0x2d0   :  { %v528_v3 = vadd.f32 %v764_v1, %v527_v2 }
 0x2d2   :  { %v531_v4 = vmax.f32 %v528_v3, 0.0 }
 0x2d4   :  { %532 = vst [vmem:[#allocation11] sm:$0xff] %v531_v4 }
 0x2d5   :  { %543 = dma.vmem_to_hbm [thread:$0]  %s539_s29, 128, %s541_s3, [#allocation4]  }
 0x2d7   :  { %v529_v5 = vpop.f32.mrf.mxu0 }
 0x2d8   :  { %915 = dma.done.wait [#allocation4], 128  }
 0x2d9   :  { %916 = vsyncadd [#allocation4], 4294967168 }
 0x2da   :  { %548 = vsyncpa [#allocation3], 1 }
 0x2db   :  { %549 = vsyncpa [#allocation6], 1 }
 0x2dc   :  { %550 = vsyncpa [#allocation9], 1 }
 0x2dd   :  { %551 = vsyncpa [#allocation4], 1 }

</bundles_post_ra>
